<compile_context>
chip_gen: v7x
topology: tpu7x:2x2x1
jax: 0.10.0
libtpu: 0.0.40
codegen_flags: <defaults>
</compile_context>

<pallas_src>
import jax
import jax.numpy as jnp
from jax.experimental import pallas as pl
from jax.experimental.pallas import tpu as pltpu


def _round_up(x, m):
    return ((x + m - 1) // m) * m


def _round_down(x, m):
    return (x // m) * m


def _cdiv(a, b):
    return -(-a // b)


def _make_readout_kernel(*, tn, n_rem, masked, static_scale):
    """Tile kernel: f32-accumulated sum over the N (reduction) grid axis."""

    def kernel(*args):
        if masked:
            scale_ref, seq_ref, msk_ref, out_ref, acc_ref = args
        else:
            seq_ref, out_ref, acc_ref = args

        k = pl.program_id(1)
        last = pl.num_programs(1) - 1

        @pl.when(k == 0)
        def _init():
            acc_ref[...] = jnp.zeros_like(acc_ref)

        # VPU path: f32 multiply + sublane reduction (no MXU matvec).
        x = seq_ref[...].astype(jnp.float32)
        if masked:
            x = x * msk_ref[...].astype(jnp.float32)

        if n_rem:
            # Ragged tail: zero the out-of-range rows of the LAST N tile in-kernel.
            # (OOB block contents are unspecified; 0 * NaN = NaN, so we must select.)
            rows = jax.lax.broadcasted_iota(jnp.int32, x.shape, 1)
            valid = jnp.where(k == last, n_rem, tn)
            x = jnp.where(rows < valid, x, 0.0)

        acc_ref[...] += jnp.sum(x, axis=1, keepdims=True)

        @pl.when(k == last)
        def _finalize():
            scale = scale_ref[0, 0] if masked else static_scale
            out_ref[...] = (acc_ref[...] * scale).astype(out_ref.dtype)

    return kernel


def avg_readout(seq, msk=None, *, tb_target=8, max_tn=None):
    """Pallas TPU implementation of AvgReadout.forward(seq, msk).

    seq: (B, N, D);  msk: (B, N) or None;  returns (B, D).
    NOTE: sum(msk) == 0 yields inf/nan, matching the PyTorch reference.
    """
    B, N, D = seq.shape
    out_dtype = seq.dtype
    seq_itemsize = jnp.dtype(seq.dtype).itemsize
    masked = msk is not None

    # ---- per-generation VMEM budget ---------------------------------------
    # ~48 MiB on 64-MiB-VMEM parts (v7x), ~96 MiB on 128-MiB parts (v5e/v6e).
    try:
        phys_vmem = int(pltpu.get_tpu_info().vmem_capacity_bytes)
    except Exception:
        phys_vmem = 64 * 1024 * 1024  # conservative fallback
    budget = min(96 * 1024 * 1024, (3 * phys_vmem) // 4)
    two_tc = phys_vmem <= 64 * 1024 * 1024  # v7x-like: 2 TensorCores / chip

    # ---- batch tile ("parallel" axis) --------------------------------------
    tb = B if B <= tb_target else tb_target
    if two_tc and B >= 2 and _cdiv(B, tb) < 2:
        tb = _cdiv(B, 2)  # give both TensorCores work on 2-TC chips
    grid_b = _cdiv(B, tb)
    b_pad = grid_b * tb

    # ---- N tile from the VMEM budget (double-buffered seq + msk tiles) -----
    d_lanes = _round_up(D, 128)  # last dim pads to 128 lanes in VMEM

    def _per_row_bytes(tb_):
        msk_row = 128 * 4 if masked else 0  # (tb, tn, 1) f32 pads lanes to 128
        return tb_ * (d_lanes * seq_itemsize + msk_row)

    tn_cap = _round_down(budget // (2 * _per_row_bytes(tb)), 128)
    while tn_cap < 128 and tb > 1:  # very large D: shrink the batch tile first
        tb = max(1, tb // 2)
        grid_b = _cdiv(B, tb)
        b_pad = grid_b * tb
        tn_cap = _round_down(budget // (2 * _per_row_bytes(tb)), 128)
    tn_cap = max(tn_cap, 128)
    if max_tn is not None:  # test / debug knob to force multi-tile reduction
        tn_cap = max(128, _round_down(min(tn_cap, max_tn), 128))

    if N <= tn_cap:
        tn, n_rem = N, 0          # single N tile (block equals full dim)
    else:
        tn, n_rem = tn_cap, N % tn_cap
    grid_n = _cdiv(N, tn)

    # ---- VMEM limit: what this configuration actually needs ----------------
    seq_tile = tb * _round_up(tn, 8) * d_lanes * seq_itemsize
    msk_tile = tb * _round_up(tn, 8) * 128 * 4 if masked else 0
    out_tile = tb * 8 * d_lanes * jnp.dtype(out_dtype).itemsize
    acc_tile = tb * 8 * d_lanes * 4
    need = 2 * (seq_tile + msk_tile + out_tile) + acc_tile + (2 << 20)
    vmem_limit = int(min(max(budget, need), phys_vmem))

    grid = (grid_b, grid_n)
    seq_spec = pl.BlockSpec((tb, tn, D), lambda b, k: (b, k, 0))
    out_spec = pl.BlockSpec((tb, 1, D), lambda b, k: (b, 0, 0))

    kernel = _make_readout_kernel(
        tn=tn, n_rem=n_rem, masked=masked,
        static_scale=None if masked else 1.0 / N)

    out_itemsize = jnp.dtype(out_dtype).itemsize
    cost = pl.CostEstimate(
        flops=(2 if masked else 1) * B * N * D,
        transcendentals=0,
        bytes_accessed=B * N * D * seq_itemsize
        + (B * N * 4 if masked else 0) + B * D * out_itemsize,
    )
    cparams = pltpu.CompilerParams(
        dimension_semantics=("parallel", "arbitrary"),
        vmem_limit_bytes=vmem_limit,
    )

    if masked:
        # Global scalar denominator reduced outside (tiny); kernel multiplies once.
        scale = (1.0 / jnp.sum(msk.astype(jnp.float32))).reshape(1, 1)
        msk3 = msk.astype(jnp.float32).reshape(B, N, 1)
        in_specs = [
            pl.BlockSpec(memory_space=pltpu.MemorySpace.SMEM),   # scale (1,1) f32
            seq_spec,                                            # seq   (B,N,D)
            pl.BlockSpec((tb, tn, 1), lambda b, k: (b, k, 0)),   # msk   (B,N,1)
        ]
        args = (scale, seq, msk3)
    else:
        in_specs = [seq_spec]
        args = (seq,)

    out = pl.pallas_call(
        kernel,
        out_shape=jax.ShapeDtypeStruct((b_pad, 1, D), out_dtype),
        grid_spec=pltpu.PrefetchScalarGridSpec(
            num_scalar_prefetch=0,
            grid=grid,
            in_specs=in_specs,
            out_specs=out_spec,
            scratch_shapes=[pltpu.VMEM((tb, 1, D), jnp.float32)],
        ),
        compiler_params=cparams,
        cost_estimate=cost,
    )(*args)

    return out[:B, 0, :]


if __name__ == "__main__":
    key = jax.random.PRNGKey(0)
    k1, k2, k3, k4, k5, k6 = jax.random.split(key, 6)

    # 1) Small shapes (batch=2, nodes=8, hidden=32): masked + mean paths.
    B, N, D = 2, 8, 32
    seq = jax.random.normal(k1, (B, N, D), dtype=jnp.float32)
    msk = (jax.random.uniform(k2, (B, N)) > 0.3).astype(jnp.float32)

    out_masked = jax.block_until_ready(avg_readout(seq, msk))
    ref_masked = jnp.sum(seq * msk[:, :, None], axis=1) / jnp.sum(msk)
    assert out_masked.shape == (B, D)
    assert jnp.allclose(out_masked, ref_masked, atol=1e-4, rtol=1e-4)

    out_mean = jax.block_until_ready(avg_readout(seq, None))
    ref_mean = jnp.mean(seq, axis=1)
    assert out_mean.shape == (B, D)
    assert jnp.allclose(out_mean, ref_mean, atol=1e-4, rtol=1e-4)

    # 2) Ragged N (300 % 128 != 0) and a partial batch tile: exercises the
    #    in-kernel iota tail masking (no wrapper-side padding of seq).
    B2, N2, D2 = 3, 300, 128
    seq2 = jax.random.normal(k3, (B2, N2, D2), dtype=jnp.float32)
    msk2 = (jax.random.uniform(k4, (B2, N2)) > 0.5).astype(jnp.float32)
    out2 = jax.block_until_ready(avg_readout(seq2, msk2, tb_target=2, max_tn=128))
    ref2 = jnp.sum(seq2 * msk2[:, :, None], axis=1) / jnp.sum(msk2)
    assert out2.shape == (B2, D2)
    assert jnp.allclose(out2, ref2, atol=1e-4, rtol=1e-4)

    out2m = jax.block_until_ready(avg_readout(seq2, None, tb_target=2, max_tn=128))
    ref2m = jnp.mean(seq2, axis=1)
    assert jnp.allclose(out2m, ref2m, atol=1e-4, rtol=1e-4)

    # 3) bf16 inputs: f32 accumulation inside the kernel, bf16 output.
    B3, N3, D3 = 2, 130, 64
    seq3 = jax.random.normal(k5, (B3, N3, D3), dtype=jnp.bfloat16)
    msk3 = (jax.random.uniform(k6, (B3, N3)) > 0.4).astype(jnp.bfloat16)
    out3 = jax.block_until_ready(avg_readout(seq3, msk3, max_tn=128))
    ref3 = (jnp.sum(seq3.astype(jnp.float32) * msk3.astype(jnp.float32)[:, :, None],
                    axis=1) / jnp.sum(msk3.astype(jnp.float32)))
    assert out3.shape == (B3, D3)
    assert jnp.allclose(out3.astype(jnp.float32), ref3, atol=1e-2, rtol=1e-2)

    print("KERNEL_OK")
</pallas_src>

<mosaic_0001>
module attributes {stable_mosaic.version = 11 : i64} {
  func.func @kernel(%arg0: i32, %arg1: i32, %arg2: memref<1x1xf32, #tpu.memory_space<smem>>, %arg3: memref<1x8x32xf32, #tpu.memory_space<vmem>>, %arg4: memref<1x8x1xf32, #tpu.memory_space<vmem>>, %arg5: memref<1x1x32xf32, #tpu.memory_space<vmem>>, %arg6: memref<1x1x32xf32, #tpu.memory_space<vmem>>) attributes {dimension_semantics = [#tpu.dimension_semantics<parallel>, #tpu.dimension_semantics<arbitrary>], iteration_bounds = array<i64: 2, 1>, scalar_prefetch = 0 : i64, scratch_operands = 1 : i64, tpu.core_type = #tpu.core_type<tc>, window_params = [{transform_indices = @transform_0, window_bounds = array<i64: 1, 1>}, {transform_indices = @transform_1, window_bounds = array<i64: 1, 8, 32>}, {transform_indices = @transform_2, window_bounds = array<i64: 1, 8, 1>}, {transform_indices = @transform_3, window_bounds = array<i64: 1, 1, 32>}]} {
    %c0_i32 = arith.constant 0 : i32
    %0 = arith.cmpi eq, %arg1, %c0_i32 : i32
    %1 = arith.extui %0 : i1 to i32
    %c0_i32_0 = arith.constant 0 : i32
    %2 = arith.cmpi ne, %1, %c0_i32_0 : i32
    scf.if %2 {
      %cst_14 = arith.constant 0.000000e+00 : f32
      %15 = vector.broadcast %cst_14 : f32 to vector<1x1x32xf32>
      %c0_15 = arith.constant 0 : index
      %c0_16 = arith.constant 0 : index
      %c0_17 = arith.constant 0 : index
      %16 = vector.load %arg6[%c0_15, %c0_16, %c0_17] : memref<1x1x32xf32, #tpu.memory_space<vmem>>, vector<1x1x32xf32>
      tpu.vector_store %arg6[%c0_15, %c0_16, %c0_17], %15 {strides = array<i32>} : memref<1x1x32xf32, #tpu.memory_space<vmem>>, vector<1x1x32xf32>,
    } else {
    }
    %c0 = arith.constant 0 : index
    %c0_1 = arith.constant 0 : index
    %c0_2 = arith.constant 0 : index
    %3 = vector.load %arg3[%c0, %c0_1, %c0_2] : memref<1x8x32xf32, #tpu.memory_space<vmem>>, vector<1x8x32xf32>
    %c0_3 = arith.constant 0 : index
    %c0_4 = arith.constant 0 : index
    %c0_5 = arith.constant 0 : index
    %4 = vector.load %arg4[%c0_3, %c0_4, %c0_5] : memref<1x8x1xf32, #tpu.memory_space<vmem>>, vector<1x8x1xf32>
    %5 = vector.broadcast %4 : vector<1x8x1xf32> to vector<1x8x32xf32>
    %6 = arith.mulf %3, %5 : vector<1x8x32xf32>
    %c0_6 = arith.constant 0 : index
    %c0_7 = arith.constant 0 : index
    %c0_8 = arith.constant 0 : index
    %7 = vector.load %arg6[%c0_6, %c0_7, %c0_8] : memref<1x1x32xf32, #tpu.memory_space<vmem>>, vector<1x1x32xf32>
    %cst = arith.constant dense<0.000000e+00> : vector<1x32xf32>
    %8 = vector.multi_reduction <add>, %6, %cst [1] : vector<1x8x32xf32> to vector<1x32xf32>
    %9 = vector.shape_cast %8 : vector<1x32xf32> to vector<1x1x32xf32>
    %10 = arith.addf %7, %9 : vector<1x1x32xf32>
    %c0_9 = arith.constant 0 : index
    %c0_10 = arith.constant 0 : index
    %c0_11 = arith.constant 0 : index
    %11 = vector.load %arg6[%c0_9, %c0_10, %c0_11] : memref<1x1x32xf32, #tpu.memory_space<vmem>>, vector<1x1x32xf32>
    tpu.vector_store %arg6[%c0_9, %c0_10, %c0_11], %10 {strides = array<i32>} : memref<1x1x32xf32, #tpu.memory_space<vmem>>, vector<1x1x32xf32>,
    %c0_i32_12 = arith.constant 0 : i32
    %12 = arith.cmpi eq, %arg1, %c0_i32_12 : i32
    %13 = arith.extui %12 : i1 to i32
    %c0_i32_13 = arith.constant 0 : i32
    %14 = arith.cmpi ne, %13, %c0_i32_13 : i32
    scf.if %14 {
      %c0_14 = arith.constant 0 : index
      %c0_15 = arith.constant 0 : index
      %15 = memref.load %arg2[%c0_14, %c0_15] : memref<1x1xf32, #tpu.memory_space<smem>>
      %c0_16 = arith.constant 0 : index
      %c0_17 = arith.constant 0 : index
      %c0_18 = arith.constant 0 : index
      %16 = vector.load %arg6[%c0_16, %c0_17, %c0_18] : memref<1x1x32xf32, #tpu.memory_space<vmem>>, vector<1x1x32xf32>
      %17 = vector.broadcast %15 : f32 to vector<1x1x32xf32>
      %18 = arith.mulf %16, %17 : vector<1x1x32xf32>
      %c0_19 = arith.constant 0 : index
      %c0_20 = arith.constant 0 : index
      %c0_21 = arith.constant 0 : index
      %19 = vector.load %arg5[%c0_19, %c0_20, %c0_21] : memref<1x1x32xf32, #tpu.memory_space<vmem>>, vector<1x1x32xf32>
      tpu.vector_store %arg5[%c0_19, %c0_20, %c0_21], %18 {strides = array<i32>} : memref<1x1x32xf32, #tpu.memory_space<vmem>>, vector<1x1x32xf32>,
    } else {
    }
    return
  }
  func.func @transform_0(%arg0: i32, %arg1: i32) -> (i32, i32) {
    %c0_i32 = arith.constant 0 : i32
    %c0_i32_0 = arith.constant 0 : i32
    %c0_i32_1 = arith.constant 0 : i32
    return %c0_i32, %c0_i32_0 : i32, i32
  }
  func.func @transform_1(%arg0: i32, %arg1: i32) -> (i32, i32, i32) {
    %c0_i32 = arith.constant 0 : i32
    %c0_i32_0 = arith.constant 0 : i32
    return %arg0, %arg1, %c0_i32 : i32, i32, i32
  }
  func.func @transform_2(%arg0: i32, %arg1: i32) -> (i32, i32, i32) {
    %c0_i32 = arith.constant 0 : i32
    %c0_i32_0 = arith.constant 0 : i32
    return %arg0, %arg1, %c0_i32 : i32, i32, i32
  }
  func.func @transform_3(%arg0: i32, %arg1: i32) -> (i32, i32, i32) {
    %c0_i32 = arith.constant 0 : i32
    %c0_i32_0 = arith.constant 0 : i32
    %c0_i32_1 = arith.constant 0 : i32
    return %arg0, %c0_i32, %c0_i32_0 : i32, i32, i32
  }
}

</mosaic_0001>

<bundles_post_ra>
// kernel: tpu_custom_call.1
= control target key start
LH: loop header
LB: loop body
LE: loop exit
PB: predicated region body
PF: predicated region fallthrough
CT: control target
= control target key end

     0   :  { %s637_s0 = inlined_call_operand.<no memory space> [shape: f32[1,1], index: 0, kind: input, shape index: {}]   ;;  %s638_s1 = inlined_call_operand.vmem [shape: f32[2,8,32], index: 1, kind: input, shape index: {}]   ;;  %s639_s2 = inlined_call_operand.vmem [shape: f32[2,8,1], index: 2, kind: input, shape index: {}]   ;;  %s640_s3 = inlined_call_operand.hbm [shape: f32[2,1,32], index: 3, kind: output, shape index: {}]  }
   0x1   :  { %8 = sst [smem:[#allocation3]] %s637_s0 }
   0x2   :  { %9 = vsyncpa [#allocation5], 0 }
   0x3   :  { %11 = vsyncpa [#allocation5 + $0x1], 0  ;;  %s519_s14 = smov 0   ;;  %s521_s15 = smov 0  }
   0x4   :  { %s523_s16 = smov 0   ;;  %s525_s17 = smov 0  }
   0x5   :  { %s527_s18 = smov 0   ;;  %s529_s19 = smov 0  }
   0x6 LB: > { %s345_s0 = sadd.s32 4294967295, %s491_s19   ;;  %s346_s20 = sadd.s32 4294967294, %s491_s19   ;;  %s491_s19 = sphi %s529_s19, %s17_s19   ;;  %s487_s18 = sphi %s527_s18, %s647_s18   ;;  %s483_s17 = sphi %s525_s17, %s646_s17   ;;  %s479_s16 = sphi %s523_s16, %s645_s16   ;;  %s475_s15 = sphi %s521_s15, %s644_s15   ;;  %s471_s14 = sphi %s519_s14, %s643_s14  }
   0x7   : > { %s29_s21 = sadd.s32 1, %s487_s18  ;;  %s113_s22 = sadd.s32 1, %s479_s16 }
   0x8   : > { %p31_p0 = scmp.ge.s32.totalorder %s29_s21, 2  ;;  %p123_p1 = scmp.ne.s32.totalorder %s479_s16, %s475_s15 }
   0x9   : > { %p124_p2 = scmp.eq.s32.totalorder %s345_s0, 1  ;;  %p129_p3 = scmp.ne.s32.totalorder %s475_s15, %s471_s14 }
   0xa   : > { %s649_s21 = smov (%p31_p0, %s29_s21), 0  ;;  %p130_p5 = scmp.eq.s32.totalorder %s346_s20, 1 }
   0xb   : > { %p559_p4 = por %p124_p2, %p123_p1  ;;  %s110_s24 = ssub.s32 %s487_s18, %s649_s21 }
   0xc   : > { %p349_p6 = scmp.ge.s32.totalorder %s491_s19, 1  ;;  %p111_p7 = scmp.eq.s32.totalorder %s110_s24, 0 }
   0xd   : > { %p566_p8 = por %p130_p5, %p129_p3  ;;  %p171_p9 = scmp.lt.s32.totalorder %s491_s19, 3 }
   0xe   : > { %s572_s26 = scalar_select %p111_p7, %s479_s16, %s113_s22  }
   0xf   : > { %p172_p10 = pnand %p349_p6, %p171_p9 }
  0x10   : > { %p203_p11 = scmp.lt.s32.totalorder (!%p172_p10), %s483_s17, 1  ;;  %v493_v0 = vmov (!%p172_p10), 0   ;;  %vm221_vm0 = vcmask (!%p172_p10), 253952   ;;  %v494_v2 = vmov (!%p172_p10), 0.0   ;;  %vm232_vm1 = vcmask (!%p172_p10), 261120   ;;  %s246_s8 = sld [smem:[#allocation3]] (!%p172_p10) }
  0x11   : > { %175 = sbr.rel (%p172_p10) target bundleno = 198 (0xc6), region = 32  ;;  %412 = vset.pattern.permute.xlu0 (!%p172_p10), %v493_v0  ;;  %222 = vst.msk [vmem:[#allocation2] sm:$0x1] (!%p172_p10), %vm221_vm0, %v494_v2  ;;  %s201_s9 = sand.u32 (!%p172_p10), 1, %s475_s15  }
  0x12   : > { %s352_s10 = sshll.u32 (!%p172_p10), %s483_s17, 4  ;;  %s202_s11 = scalar_lea.vmem (!%p172_p10), [#allocation4], %s201_s9 }
  0x13   : > { %s264_s12 = sshll.u32 (!%p172_p10), %s202_s11, 4  ;;  %s589_s20 = scalar_lea.hbm (!%p172_p10), %s640_s3, %s352_s10  ;;  %s591_s12 = int_to_ptr.vmem [resolvable:$true] %s264_s12 }
  0x14   : > { %s252_s22 = scalar_lea.sflag (!%p172_p10), [#allocation5], %s201_s9  ;;  %s413_s24 = scalar_lea.vmem (!%p172_p10), %s591_s12, 16 }
  0x15   : > { %p414_p12 = scmp.ne.s32.totalorder (!%p172_p10), %s591_s12, %s413_s24 }
  0x16   : > { %v248_v15 = vstv (!%p172_p10), %s246_s8 }
  0x17   : > { %p415_p13 = pnand (!%p172_p10), %p414_p12, %p559_p4 }
  0x18   : > { %s204_s27 = scalar_select %p203_p11, %s483_s17, 1  ;;  %v231_v12 = vld [vmem:[#allocation2] sm:$0x1] }
  0x19   : > { %p416_p0 = pneg %p415_p13  ;;  %s495_s17 = smov [#allocation4]  }
  0x1a   : > { %s350_s28 = sshll.u32 %s204_s27, 3  ;;  %s417_s27 = sshll.u32 %s495_s17, 4  ;;  %s418_s27 = int_to_ptr.vmem [resolvable:$false] %s417_s27 }
  0x1b   : > { %s216_s4 = scalar_lea.vmem %s639_s2, %s350_s28  ;;  %s209_s7 = scalar_lea.vmem %s638_s1, %s350_s28 }
  0x1c   : > { %v224_v1 = vld [vmem:[%s216_s4] sm:$0xff]  ;;  %s419_s28 = scalar_lea.vmem %s418_s27, 32  ;;  %p420_p1 = scmp.lt.s32.totalorder %s591_s12, %s418_s27 }
  0x1d   : > { %227 = vperm.xlu0 %412, %v224_v1   ;;  %v223_v3 = vld [vmem:[%s209_s7] sm:$0xff]  ;;  %p421_p2 = scmp.lt.s32.totalorder %s419_s28, %s413_s24 }
  0x1f   : > { %p422_p3 = por %p421_p2, %p420_p1 }
  0x21   : > { %p423_p5 = pnand %p422_p3, %p416_p0 }
  0x9c   : > { %v228_v4 = vpop.permute.xlu0 %227 }
  0x9d   : > { %v230_v5 = vmul.f32 %v228_v4, %v223_v3 }
  0x9f   : > { %v233_v6 = vsel %vm232_vm1, %v230_v5, 0.0 }
  0xa0   : > { %v234_v7 = vrot.slane %v233_v6, 4 }
  0xa2   : > { %v235_v8 = vadd.f32 %v234_v7, %v233_v6 }
  0xa4   : > { %v236_v9 = vrot.slane %v235_v8, 2 }
  0xa6   : > { %v237_v10 = vadd.f32 %v236_v9, %v235_v8 }
  0xa8   : > { %v238_v11 = vrot.slane %v237_v10, 1 }
  0xaa   : > { %v239_v13 = vadd.f32 %v238_v11, %v237_v10 }
  0xac   : > { %v240_v14 = vadd.f32 %v239_v13, %v231_v12 }
  0xae   : > { %242 = vst.msk [vmem:[#allocation2] sm:$0x1] %vm221_vm0, %v240_v14 }
  0xb5   : > { %v247_v16 = vld [vmem:[#allocation2] sm:$0x1] }
  0xb6   : > { %v249_v17 = vmul.f32 %v248_v15, %v247_v16 }
  0xb8   : > { %250 = vst.msk [vmem:[%s202_s11] sm:$0x1] %vm221_vm0, %v249_v17 }
  0xb9   : > { %426 = shalt.err (!%p423_p5)
}
  0xba   : > { %s427_s29 = scalar_lea.hbm %s589_s20, 16  ;;  %s431_s5 = scalar_lea.hbm %s640_s3, 32 }
  0xbb   : > { %p428_p6 = scmp.ne.s32.totalorder %s589_s20, %s427_s29  ;;  %p432_p10 = scmp.lt.u32.totalorder %s589_s20, %s640_s3 }
  0xbc   : > { %p433_p11 = scmp.lt.u32.totalorder %s431_s5, %s427_s29  ;;  %p435_p13 = scmp.lt.u32.totalorder %s427_s29, %s589_s20 }
  0xbd   : > { %p429_p7 = pnand %p428_p6, %p559_p4 }
  0xbe   : > { %p434_p12 = por %p433_p11, %p432_p10 }
  0xbf   : > { %p430_p9 = pneg %p429_p7 }
  0xc0   : > { %p436_p0 = por %p435_p13, %p434_p12 }
  0xc2   : > { %p437_p1 = pnand %p436_p0, %p430_p9 }
  0xc4   : > { %440 = shalt.err (!%p437_p1)
}
  0xc5   : > { %355 = dma.vmem_to_hbm [thread:$0]  (%p559_p4), %s591_s12, 16, %s589_s20, %s252_s22  }
  0xc6 PF: > { %p361_p2 = scmp.ge.s32.totalorder %s491_s19, 2  ;;  %s276_s8 = sand.u32 1, %s471_s14  }
  0xc7   : > { %s277_s9 = scalar_lea.sflag [#allocation5], %s276_s8 }
  0xc8   : > { %p358_p3 = pnand %p361_p2, %p566_p8 }
  0xca   : > { %466 = dma.done.wait (!%p358_p3), %s277_s9, 16  }
  0xcb   : > { %468 = vsyncadd (!%p358_p3), %s277_s9, 4294967280  ;;  %s17_s19 = sadd.s32 1, %s491_s19   ;;  %s643_s14 = smov %s475_s15 }
  0xcc   : > { %p14_p5 = scmp.ge.s32.totalorder %s17_s19, 4   ;;  %s644_s15 = smov %s479_s16 }
  0xcd   : > { %s645_s16 = smov %s572_s26  ;;  %s646_s17 = smov %s487_s18 }
  0xce   : > { %s647_s18 = smov %s649_s21  ;;  %16 = sbr.rel (!%p14_p5) target bundleno = 6 (0x6), region = 78 }
  0xd5   :  { %281 = vsyncpa [#allocation5], 1 }
  0xd6   :  { %283 = vsyncpa [#allocation5 + $0x1], 1 }

</bundles_post_ra>
